<compile_context>
chip_gen: v5e
topology: v5e:2x2
jax: 0.10.0
libtpu: 0.0.40
codegen_flags: <defaults>
</compile_context>

<pallas_src>
import functools

import jax
import jax.numpy as jnp
from jax.experimental import pallas as pl
from jax.experimental.pallas import tpu as pltpu

EPS = 1e-5


def _round_up(x, m):
    return (x + m - 1) // m * m


def conv_relu_stats_kernel(patches_ref, w_ref, b_ref, y_ref, stats_ref, *, tm, m_real):
    """Pass 1: y = relu(patches @ w + b); accumulate per-channel sum / sum-of-squares."""
    i = pl.program_id(0)

    @pl.when(i == 0)
    def _():
        stats_ref[...] = jnp.zeros_like(stats_ref)

    # bf16 x bf16 -> f32 accumulate on the MXU.
    y = jnp.dot(patches_ref[...], w_ref[...], preferred_element_type=jnp.float32)
    y = jnp.maximum(y + b_ref[...], 0.0)            # bias + ReLU in f32
    y_ref[...] = y                                  # lane-dense (TM, C_pad) store

    # Mask M-padding rows so they don't pollute the batch statistics.
    row = i * tm + jax.lax.broadcasted_iota(jnp.int32, (tm, 1), 0)
    ym = jnp.where(row < m_real, y, 0.0)

    # Per-channel reductions routed through the MXU (ones-row matmuls) instead of a
    # cross-sublane XLU reduce; single full-block f32 accumulate into the resident stats.
    ones_row = jnp.ones((1, tm), jnp.float32)
    s0 = jnp.dot(ones_row, ym, preferred_element_type=jnp.float32)        # (1, C_pad)
    s1 = jnp.dot(ones_row, ym * ym, preferred_element_type=jnp.float32)   # (1, C_pad)
    stats_ref[...] += jnp.concatenate([s0, s1], axis=0)                   # (2, C_pad)


def bn_apply_kernel(y_ref, scale_ref, shift_ref, out_ref):
    """Pass 2: out = y * scale + shift  (BN affine folded into one FMA per element)."""
    out_ref[...] = (y_ref[...] * scale_ref[...] + shift_ref[...]).astype(out_ref.dtype)


def im2col_1d(x, kernel_size, stride):
    # x: (N, C_in, L) -> (N*L_out, C_in*kernel_size), (C, K)-flattened patch rows.
    n, c, l = x.shape
    l_out = (l - kernel_size) // stride + 1
    idx = jnp.arange(l_out)[:, None] * stride + jnp.arange(kernel_size)[None, :]  # (L_out, K)
    patches = x[:, :, idx]                      # (N, C, L_out, K)
    patches = patches.transpose(0, 2, 1, 3)     # (N, L_out, C, K)
    return patches.reshape(n * l_out, c * kernel_size), l_out


@functools.partial(jax.jit, static_argnames=("kernel_size", "stride"))
def conv_block_forward(x, weight, bias, gamma, beta, *, kernel_size, stride):
    """x: (N, C_in, L) f32; weight: (C_out, C_in, K); bias/gamma/beta: (C_out,).
    Returns (N, C_out, L_out), matching PyTorch ConvBlock.forward in training mode."""
    n, c_in, l = x.shape
    c_out = weight.shape[0]
    l_out = (l - kernel_size) // stride + 1
    m = n * l_out
    ck = c_in * kernel_size

    # Lane-dense channel padding and M-tile selection.
    c_pad = _round_up(c_out, 128)
    tm = 512 if m >= 512 else _round_up(m, 8)
    m_pad = _round_up(m, tm)
    n_tiles = m_pad // tm

    # im2col + padding, fused under jit; bf16 inputs to the MXU.
    patches, _ = im2col_1d(x.astype(jnp.float32), kernel_size, stride)      # (m, ck)
    patches = jnp.pad(patches, ((0, m_pad - m), (0, 0))).astype(jnp.bfloat16)
    w2d = weight.reshape(c_out, ck).T.astype(jnp.float32)                   # (ck, c_out)
    w2d = jnp.pad(w2d, ((0, 0), (0, c_pad - c_out))).astype(jnp.bfloat16)   # (ck, c_pad)
    b2d = jnp.pad(bias.astype(jnp.float32), (0, c_pad - c_out)).reshape(1, c_pad)

    # ---- Pass 1: conv + bias + ReLU, with per-channel sum / sumsq accumulation ----
    kern1 = functools.partial(conv_relu_stats_kernel, tm=tm, m_real=m)
    y, stats = pl.pallas_call(
        kern1,
        out_shape=(
            jax.ShapeDtypeStruct((m_pad, c_pad), jnp.float32),
            jax.ShapeDtypeStruct((2, c_pad), jnp.float32),
        ),
        grid=(n_tiles,),
        in_specs=[
            pl.BlockSpec((tm, ck), lambda i: (i, 0)),       # patches tile
            pl.BlockSpec((ck, c_pad), lambda i: (0, 0)),    # weight (resident)
            pl.BlockSpec((1, c_pad), lambda i: (0, 0)),     # bias   (resident)
        ],
        out_specs=(
            pl.BlockSpec((tm, c_pad), lambda i: (i, 0)),    # y tile
            pl.BlockSpec((2, c_pad), lambda i: (0, 0)),     # stats accumulator (resident)
        ),
        compiler_params=pltpu.CompilerParams(
            dimension_semantics=("arbitrary",),             # reduction axis for stats
        ),
    )(patches, w2d, b2d)

    # ---- Finalize batch statistics (tiny per-channel vectors, plain JAX) ----
    mean = stats[0] / m
    var = jnp.maximum(stats[1] / m - mean * mean, 0.0)      # biased var (PyTorch BN training)
    inv = jax.lax.rsqrt(var + EPS)
    g = jnp.pad(gamma.astype(jnp.float32), (0, c_pad - c_out), constant_values=1.0)
    bt = jnp.pad(beta.astype(jnp.float32), (0, c_pad - c_out))
    scale = (g * inv).reshape(1, c_pad)
    shift = (bt - mean * g * inv).reshape(1, c_pad)

    # ---- Pass 2: normalize in place (single FMA per element, parallel over tiles) ----
    out = pl.pallas_call(
        bn_apply_kernel,
        out_shape=jax.ShapeDtypeStruct((m_pad, c_pad), jnp.float32),
        grid=(n_tiles,),
        in_specs=[
            pl.BlockSpec((tm, c_pad), lambda i: (i, 0)),
            pl.BlockSpec((1, c_pad), lambda i: (0, 0)),
            pl.BlockSpec((1, c_pad), lambda i: (0, 0)),
        ],
        out_specs=pl.BlockSpec((tm, c_pad), lambda i: (i, 0)),
        input_output_aliases={0: 0},                        # reuse y's HBM buffer
        compiler_params=pltpu.CompilerParams(
            dimension_semantics=("parallel",),              # megacore-friendly
        ),
    )(y, scale, shift)

    # Strip padding and return PyTorch NCL layout.
    out = out[:m, :c_out].reshape(n, l_out, c_out)
    return out.transpose(0, 2, 1)


if __name__ == "__main__":
    # ConvBlock(in_channels=4, out_channels=8, kernel_size=3, stride=2) on X (N=2, C_in=4, L=16).
    N, C_IN, L = 2, 4, 16
    C_OUT, K, STRIDE = 8, 3, 2

    key = jax.random.PRNGKey(0)
    kx, kw, kb, kg, kbe = jax.random.split(key, 5)
    x = jax.random.normal(kx, (N, C_IN, L), dtype=jnp.float32)
    weight = jax.random.normal(kw, (C_OUT, C_IN, K), dtype=jnp.float32) * 0.1
    bias = jax.random.normal(kb, (C_OUT,), dtype=jnp.float32) * 0.1
    gamma = jnp.ones((C_OUT,), dtype=jnp.float32) + 0.05 * jax.random.normal(kg, (C_OUT,))
    beta = 0.05 * jax.random.normal(kbe, (C_OUT,), dtype=jnp.float32)

    y = conv_block_forward(x, weight, bias, gamma, beta, kernel_size=K, stride=STRIDE)
    jax.block_until_ready(y)

    # Pure-JAX reference of the same math (bf16-rounded matmul inputs, f32 elsewhere).
    patches, l_out = im2col_1d(x, K, STRIDE)
    p_bf = patches.astype(jnp.bfloat16).astype(jnp.float32)
    w_bf = weight.reshape(C_OUT, -1).astype(jnp.bfloat16).astype(jnp.float32)
    ref = jnp.maximum(p_bf @ w_bf.T + bias[None, :], 0.0)
    mean = ref.mean(axis=0, keepdims=True)
    var = ((ref - mean) ** 2).mean(axis=0, keepdims=True)
    ref = (ref - mean) / jnp.sqrt(var + EPS) * gamma[None, :] + beta[None, :]
    ref = ref.reshape(N, l_out, C_OUT).transpose(0, 2, 1)

    assert y.shape == (N, C_OUT, l_out)
    err = float(jnp.max(jnp.abs(y - ref)))
    assert jnp.allclose(y, ref, atol=2e-3, rtol=2e-3), err

    print("KERNEL_OK")
</pallas_src>

<mosaic_0001>
module attributes {stable_mosaic.version = 11 : i64} {
  func.func @conv_relu_stats_kernel(%arg0: i32, %arg1: memref<16x12xbf16, #tpu.memory_space<vmem>>, %arg2: memref<12x128xbf16, #tpu.memory_space<vmem>>, %arg3: memref<1x128xf32, #tpu.memory_space<vmem>>, %arg4: memref<16x128xf32, #tpu.memory_space<vmem>>, %arg5: memref<2x128xf32, #tpu.memory_space<vmem>>) attributes {dimension_semantics = [#tpu.dimension_semantics<arbitrary>], iteration_bounds = array<i64: 1>, scalar_prefetch = 0 : i64, scratch_operands = 0 : i64, tpu.core_type = #tpu.core_type<tc>, window_params = [{transform_indices = @transform_0, window_bounds = array<i64: 16, 12>}, {pipeline_mode = #tpu.pipeline_mode<synchronous>, transform_indices = @transform_1, window_bounds = array<i64: 12, 128>}, {pipeline_mode = #tpu.pipeline_mode<synchronous>, transform_indices = @transform_2, window_bounds = array<i64: 1, 128>}, {transform_indices = @transform_3, window_bounds = array<i64: 16, 128>}, {pipeline_mode = #tpu.pipeline_mode<synchronous>, transform_indices = @transform_4, window_bounds = array<i64: 2, 128>}]} {
    %c0_i32 = arith.constant 0 : i32
    %0 = arith.cmpi eq, %arg0, %c0_i32 : i32
    %1 = arith.extui %0 : i1 to i32
    %c0_i32_0 = arith.constant 0 : i32
    %2 = arith.cmpi ne, %1, %c0_i32_0 : i32
    scf.if %2 {
      %cst_17 = arith.constant 0.000000e+00 : f32
      %30 = vector.broadcast %cst_17 : f32 to vector<2x128xf32>
      %c0_18 = arith.constant 0 : index
      %c0_19 = arith.constant 0 : index
      %31 = vector.load %arg5[%c0_18, %c0_19] : memref<2x128xf32, #tpu.memory_space<vmem>>, vector<2x128xf32>
      tpu.vector_store %arg5[%c0_18, %c0_19], %30 {strides = array<i32>} : memref<2x128xf32, #tpu.memory_space<vmem>>, vector<2x128xf32>,
    } else {
    }
    %c0 = arith.constant 0 : index
    %c0_1 = arith.constant 0 : index
    %3 = vector.load %arg1[%c0, %c0_1] : memref<16x12xbf16, #tpu.memory_space<vmem>>, vector<16x12xbf16>
    %c0_2 = arith.constant 0 : index
    %c0_3 = arith.constant 0 : index
    %4 = vector.load %arg2[%c0_2, %c0_3] : memref<12x128xbf16, #tpu.memory_space<vmem>>, vector<12x128xbf16>
    %cst = arith.constant dense<0.000000e+00> : vector<16x128xf32>
    %5 = tpu.matmul %3, %4, %cst {dimension_numbers = #tpu.dot_dimension_numbers<[1], [0], [0], [1], [0, 0, 1, 1], [], []>} : vector<16x12xbf16>, vector<12x128xbf16>, vector<16x128xf32> -> vector<16x128xf32>
    %c0_4 = arith.constant 0 : index
    %c0_5 = arith.constant 0 : index
    %6 = vector.load %arg3[%c0_4, %c0_5] : memref<1x128xf32, #tpu.memory_space<vmem>>, vector<1x128xf32>
    %7 = vector.broadcast %6 : vector<1x128xf32> to vector<16x128xf32>
    %8 = arith.addf %5, %7 : vector<16x128xf32>
    %cst_6 = arith.constant 0.000000e+00 : f32
    %9 = vector.broadcast %cst_6 : f32 to vector<16x128xf32>
    %10 = arith.maximumf %8, %9 : vector<16x128xf32>
    %c0_7 = arith.constant 0 : index
    %c0_8 = arith.constant 0 : index
    %11 = vector.load %arg4[%c0_7, %c0_8] : memref<16x128xf32, #tpu.memory_space<vmem>>, vector<16x128xf32>
    tpu.vector_store %arg4[%c0_7, %c0_8], %10 {strides = array<i32>} : memref<16x128xf32, #tpu.memory_space<vmem>>, vector<16x128xf32>,
    %c16_i32 = arith.constant 16 : i32
    %12 = arith.muli %arg0, %c16_i32 : i32
    %13 = tpu.iota {dimensions = array<i32: 0>} : vector<16x1xi32>
    %14 = vector.broadcast %12 : i32 to vector<16x1xi32>
    %15 = arith.addi %14, %13 : vector<16x1xi32>
    %c14_i32 = arith.constant 14 : i32
    %16 = vector.broadcast %c14_i32 : i32 to vector<16x1xi32>
    %17 = arith.cmpi slt, %15, %16 : vector<16x1xi32>
    %cst_9 = arith.constant 0.000000e+00 : f32
    %18 = vector.shape_cast %17 : vector<16x1xi1> to vector<16x1xi1>
    %19 = vector.broadcast %18 : vector<16x1xi1> to vector<16x128xi1>
    %20 = vector.broadcast %cst_9 : f32 to vector<16x128xf32>
    %21 = arith.select %19, %10, %20 : vector<16x128xi1>, vector<16x128xf32>
    %cst_10 = arith.constant 1.000000e+00 : f32
    %22 = vector.broadcast %cst_10 : f32 to vector<1x16xf32>
    %cst_11 = arith.constant dense<0.000000e+00> : vector<1x128xf32>
    %23 = tpu.matmul %22, %21, %cst_11 {dimension_numbers = #tpu.dot_dimension_numbers<[1], [0], [0], [1], [0, 0, 1, 1], [], []>} : vector<1x16xf32>, vector<16x128xf32>, vector<1x128xf32> -> vector<1x128xf32>
    %24 = arith.mulf %21, %21 : vector<16x128xf32>
    %cst_12 = arith.constant dense<0.000000e+00> : vector<1x128xf32>
    %25 = tpu.matmul %22, %24, %cst_12 {dimension_numbers = #tpu.dot_dimension_numbers<[1], [0], [0], [1], [0, 0, 1, 1], [], []>} : vector<1x16xf32>, vector<16x128xf32>, vector<1x128xf32> -> vector<1x128xf32>
    %c0_13 = arith.constant 0 : index
    %c0_14 = arith.constant 0 : index
    %26 = vector.load %arg5[%c0_13, %c0_14] : memref<2x128xf32, #tpu.memory_space<vmem>>, vector<2x128xf32>
    %27 = tpu.concatenate %23, %25 in 0 : vector<1x128xf32>, vector<1x128xf32> -> vector<2x128xf32>
    %28 = arith.addf %26, %27 : vector<2x128xf32>
    %c0_15 = arith.constant 0 : index
    %c0_16 = arith.constant 0 : index
    %29 = vector.load %arg5[%c0_15, %c0_16] : memref<2x128xf32, #tpu.memory_space<vmem>>, vector<2x128xf32>
    tpu.vector_store %arg5[%c0_15, %c0_16], %28 {strides = array<i32>} : memref<2x128xf32, #tpu.memory_space<vmem>>, vector<2x128xf32>,
    return
  }
  func.func @transform_0(%arg0: i32) -> (i32, i32) {
    %c0_i32 = arith.constant 0 : i32
    %c0_i32_0 = arith.constant 0 : i32
    return %arg0, %c0_i32 : i32, i32
  }
  func.func @transform_1(%arg0: i32) -> (i32, i32) {
    %c0_i32 = arith.constant 0 : i32
    %c0_i32_0 = arith.constant 0 : i32
    %c0_i32_1 = arith.constant 0 : i32
    return %c0_i32, %c0_i32_0 : i32, i32
  }
  func.func @transform_2(%arg0: i32) -> (i32, i32) {
    %c0_i32 = arith.constant 0 : i32
    %c0_i32_0 = arith.constant 0 : i32
    %c0_i32_1 = arith.constant 0 : i32
    return %c0_i32, %c0_i32_0 : i32, i32
  }
  func.func @transform_3(%arg0: i32) -> (i32, i32) {
    %c0_i32 = arith.constant 0 : i32
    %c0_i32_0 = arith.constant 0 : i32
    return %arg0, %c0_i32 : i32, i32
  }
  func.func @transform_4(%arg0: i32) -> (i32, i32) {
    %c0_i32 = arith.constant 0 : i32
    %c0_i32_0 = arith.constant 0 : i32
    %c0_i32_1 = arith.constant 0 : i32
    return %c0_i32, %c0_i32_0 : i32, i32
  }
}

module attributes {stable_mosaic.version = 11 : i64} {
  func.func @bn_apply_kernel(%arg0: i32, %arg1: memref<16x128xf32, #tpu.memory_space<vmem>>, %arg2: memref<1x128xf32, #tpu.memory_space<vmem>>, %arg3: memref<1x128xf32, #tpu.memory_space<vmem>>, %arg4: memref<16x128xf32, #tpu.memory_space<vmem>>) attributes {dimension_semantics = [#tpu.dimension_semantics<parallel>], iteration_bounds = array<i64: 1>, scalar_prefetch = 0 : i64, scratch_operands = 0 : i64, tpu.core_type = #tpu.core_type<tc>, window_params = [{transform_indices = @transform_0, window_bounds = array<i64: 16, 128>}, {pipeline_mode = #tpu.pipeline_mode<synchronous>, transform_indices = @transform_1, window_bounds = array<i64: 1, 128>}, {pipeline_mode = #tpu.pipeline_mode<synchronous>, transform_indices = @transform_2, window_bounds = array<i64: 1, 128>}, {transform_indices = @transform_3, window_bounds = array<i64: 16, 128>}]} {
    %c0 = arith.constant 0 : index
    %c0_0 = arith.constant 0 : index
    %0 = vector.load %arg1[%c0, %c0_0] : memref<16x128xf32, #tpu.memory_space<vmem>>, vector<16x128xf32>
    %c0_1 = arith.constant 0 : index
    %c0_2 = arith.constant 0 : index
    %1 = vector.load %arg2[%c0_1, %c0_2] : memref<1x128xf32, #tpu.memory_space<vmem>>, vector<1x128xf32>
    %2 = vector.broadcast %1 : vector<1x128xf32> to vector<16x128xf32>
    %3 = arith.mulf %0, %2 : vector<16x128xf32>
    %c0_3 = arith.constant 0 : index
    %c0_4 = arith.constant 0 : index
    %4 = vector.load %arg3[%c0_3, %c0_4] : memref<1x128xf32, #tpu.memory_space<vmem>>, vector<1x128xf32>
    %5 = vector.broadcast %4 : vector<1x128xf32> to vector<16x128xf32>
    %6 = arith.addf %3, %5 : vector<16x128xf32>
    %c0_5 = arith.constant 0 : index
    %c0_6 = arith.constant 0 : index
    %7 = vector.load %arg4[%c0_5, %c0_6] : memref<16x128xf32, #tpu.memory_space<vmem>>, vector<16x128xf32>
    tpu.vector_store %arg4[%c0_5, %c0_6], %6 {strides = array<i32>} : memref<16x128xf32, #tpu.memory_space<vmem>>, vector<16x128xf32>,
    return
  }
  func.func @transform_0(%arg0: i32) -> (i32, i32) {
    %c0_i32 = arith.constant 0 : i32
    %c0_i32_0 = arith.constant 0 : i32
    return %arg0, %c0_i32 : i32, i32
  }
  func.func @transform_1(%arg0: i32) -> (i32, i32) {
    %c0_i32 = arith.constant 0 : i32
    %c0_i32_0 = arith.constant 0 : i32
    %c0_i32_1 = arith.constant 0 : i32
    return %c0_i32, %c0_i32_0 : i32, i32
  }
  func.func @transform_2(%arg0: i32) -> (i32, i32) {
    %c0_i32 = arith.constant 0 : i32
    %c0_i32_0 = arith.constant 0 : i32
    %c0_i32_1 = arith.constant 0 : i32
    return %c0_i32, %c0_i32_0 : i32, i32
  }
  func.func @transform_3(%arg0: i32) -> (i32, i32) {
    %c0_i32 = arith.constant 0 : i32
    %c0_i32_0 = arith.constant 0 : i32
    return %arg0, %c0_i32 : i32, i32
  }
}

</mosaic_0001>

<bundles_post_ra>
// kernel: conv_block_forward.3
= control target key start
LH: loop header
LB: loop body
LE: loop exit
PB: predicated region body
PF: predicated region fallthrough
CT: control target
= control target key end

     0   :  { %s74_s0 = inlined_call_operand.vmem [shape: f32[16,128], index: 0, kind: input, shape index: {}, may-alias: {0,3}]   ;;  %s75_s1 = inlined_call_operand.vmem [shape: f32[1,128], index: 1, kind: input, shape index: {}]   ;;  %s76_s2 = inlined_call_operand.vmem [shape: f32[1,128], index: 2, kind: input, shape index: {}]   ;;  %s77_s3 = inlined_call_operand.vmem [shape: f32[16,128], index: 3, kind: output, shape index: {}, may-alias: {0,3}]  }
   0x1   :  { %v14_v0 = vld [vmem:[%s74_s0] sm:$0xff]  ;;  %v15_v3 = vld [vmem:[%s74_s0 + $0x8] sm:$0xff] }
   0x2   :  { %v34_v1 = vld [vmem:[%s75_s1] ss:$0 sm:$0xff] }
   0x3   :  { %v35_v2 = vld [vmem:[%s76_s2] ss:$0 sm:$0xff]  ;;  %v20_v4 = vmul.f32 %v34_v1, %v14_v0  ;;  %v21_v5 = vmul.f32 %v34_v1, %v15_v3 }
   0x5   :  { %v26_v6 = vadd.f32 %v35_v2, %v20_v4  ;;  %v27_v7 = vadd.f32 %v35_v2, %v21_v5 }
   0x7   :  { %28 = vst [vmem:[%s77_s3] sm:$0xff] %v26_v6 }
   0x8   :  { %29 = vst [vmem:[%s77_s3 + $0x8] sm:$0xff] %v27_v7 }

// kernel: conv_block_forward.2
= control target key start
LH: loop header
LB: loop body
LE: loop exit
PB: predicated region body
PF: predicated region fallthrough
CT: control target
= control target key end

     0   :  { %vm44_vm0 = vcmask 1045504   ;;  %vm40_vm1 = vcmask 97280   ;;  %v67_v6 = vlaneseq  ;;  %vm81_vm3 = vcmask 130048   ;;  %s214_s1 = inlined_call_operand.vmem [shape: bf16[12,128], index: 1, kind: input, shape index: {}]   ;;  %s215_s0 = inlined_call_operand.vmem [shape: bf16[16,12], index: 0, kind: input, shape index: {}]   ;;  %s216_s2 = inlined_call_operand.vmem [shape: f32[1,128], index: 2, kind: input, shape index: {}]   ;;  %s217_s3 = inlined_call_operand.vmem [shape: f32[16,128], index: 3, kind: output, shape index: {0}]   ;;  %s218_s4 = inlined_call_operand.vmem [shape: f32[2,128], index: 4, kind: output, shape index: {1}]  }
   0x1   :  { %v149_v0 = vld [vmem:[%s214_s1] sm:$0xf]  ;;  %v156_v1 = vld [vmem:[%s214_s1] sm:$0x30]  ;;  %v160_v18 = vmov 1.0   ;;  %v161_v19 = vmov 0.0  }
   0x2   :  { %v150_v2 = vor.u32 %v156_v1, %v149_v0  ;;  %v155_v4 = vld [vmem:[%s215_s0] sm:$0xff]  ;;  %v68_v9 = vshrl.u32 %v67_v6, 7  ;;  %21 = vst [vmem:[%s218_s4] sm:$0x3] %v161_v19  ;;  %vm131_vm4 = vcmask 1040384  }
   0x3   :  { %v159_v5 = vld [vmem:[%s216_s2] ss:$0 sm:$0xff] }
   0x4   :  { %v46_v3 = vsel %vm44_vm0, %v150_v2, 0  ;;  %v69_v11 = vadd.s32 8, %v68_v9 }
   0x5   :  { %55 = vmatpush.bf16.msra.mxu0 %v46_v3 }
   0x6   :  { %vm74_vm2 = vcmp.lt.s32.totalorder %v69_v11, 14 }
   0x8   :  { %151 = vmatmul.msk.bf16.vlgmr.msra.gmra.mxu0 %vm40_vm1, %v155_v4 }
   0x9   :  { %v127_v23 = vld [vmem:[%s218_s4] sm:$0x3] }
  0x85   :  { %v57_v7 = vpop.f32.mrf.mxu0 }
  0x86   :  { %v58_v8 = vadd.f32 %v159_v5, %v57_v7 }
  0x88   :  { %v62_v10 = vmax.f32 %v58_v8, 0.0 }
  0x8a   :  { %64 = vst [vmem:[%s217_s3] sm:$0xff] %v62_v10  ;;  %v105_v17 = vmul.f32 %v62_v10, %v62_v10 }
  0x8d   :  { %v59_v12 = vpop.f32.mrf.mxu0 }
  0x8e   :  { %v60_v13 = vadd.f32 %v159_v5, %v59_v12 }
  0x90   :  { %v63_v14 = vmax.f32 %v60_v13, 0.0 }
  0x92   :  { %65 = vst [vmem:[%s217_s3 + $0x8] sm:$0xff] %v63_v14  ;;  %152 = vmatpush.msk.msra.mxu1 %vm74_vm2, %v63_v14  ;;  %v80_v15 = vsel %vm74_vm2, %v63_v14, 0.0 }
  0x93   :  { %v106_v16 = vmul.f32 %v80_v15, %v80_v15 }
  0x94   :  { %100 = vmatpush.msra.mxu1 %v62_v10 }
  0x95   :  { %121 = vmatpush.msra.mxu2 %v106_v16  ;;  %153 = vmatmul.msk.f32.vlgmr.msra.gmra.mxu1 %vm81_vm3, %v160_v18 }
  0x97   :  { %122 = vmatpush.msra.mxu2 %v105_v17 }
  0x98   :  { %154 = vmatmul.msk.f32.vlgmr.msra.gmra.mxu2 %vm81_vm3, %v160_v18 }
 0x112   :  { %v102_v21 = vpop.f32.mrf.mxu1 }
 0x11b   :  { %v124_v20 = vpop.f32.mrf.mxu2 }
 0x11c   :  { %v129_v22 = vrot.slane %v124_v20, 7 }
 0x11e   :  { %v132_v24 = vsel %vm131_vm4, %v102_v21, %v129_v22 }
 0x11f   :  { %v133_v25 = vadd.f32 %v132_v24, %v127_v23 }
 0x121   :  { %134 = vst [vmem:[%s218_s4] sm:$0x3] %v133_v25 }

</bundles_post_ra>
